<compile_context>
chip_gen: v7x
topology: tpu7x:2x2x1
jax: 0.10.0
libtpu: 0.0.40
codegen_flags: <defaults>
</compile_context>

<pallas_src>
import functools

import jax
import jax.numpy as jnp
from jax.experimental import pallas as pl
from jax.experimental.pallas import tpu as pltpu

REPARAM_NOISE = 1e-6


# ----------------------------------------------------------------------------
# Kernel: full 3-layer MLP + fused (mu|sigma) head on one batch tile.
# Shapes (per grid step):
#   x : (input_dim, tb)      w1: (fc1, input_dim)   b1: (fc1, 1)
#   h1: (fc1, tb)            w2: (fc2, fc1)         b2: (fc2, 1)
#   h2: (fc2, tb)            wh: (head_pad, fc2)    bh/lo/hi: (head_pad, 1)
#   y : (head_pad, tb)   -> rows [0,n_actions)=mu, [n_actions,2n)=sigma, rest pad
# ----------------------------------------------------------------------------
def actor_forward_kernel(x_ref, w1_ref, b1_ref, w2_ref, b2_ref,
                         wh_ref, bh_ref, lo_ref, hi_ref, out_ref):
    x = x_ref[...]

    # fc1 + relu  (lane-dense: batch on the 128-lane axis)
    h1 = jnp.dot(w1_ref[...], x, preferred_element_type=jnp.float32) + b1_ref[...]
    h1 = jnp.maximum(h1, 0.0)

    # fc2 + relu
    h2 = jnp.dot(w2_ref[...], h1, preferred_element_type=jnp.float32) + b2_ref[...]
    h2 = jnp.maximum(h2, 0.0)

    # fused mu|sigma head (one MXU op), then per-row clamp bounds:
    # mu rows: (-inf, +inf) -> pass-through; sigma rows: (1e-6, 1.0).
    y = jnp.dot(wh_ref[...], h2, preferred_element_type=jnp.float32) + bh_ref[...]
    y = jnp.minimum(jnp.maximum(y, lo_ref[...]), hi_ref[...])

    out_ref[...] = y.astype(out_ref.dtype)


# ----------------------------------------------------------------------------
# One-time parameter prep (hoisted out of the per-call path).
# Accepts PyTorch nn.Linear layout: weights (out_features, in_features),
# biases (out_features,).
# ----------------------------------------------------------------------------
def prepare_actor_params(params, dtype=jnp.float32):
    w1, b1, w2, b2, wmu, bmu, wsig, bsig = params
    fc1_dims, input_dim = w1.shape
    fc2_dims = w2.shape[0]
    n_actions = wmu.shape[0]

    head_n = 2 * n_actions
    head_pad = max(8, pl.cdiv(head_n, 8) * 8)   # sublane-aligned head rows

    wh = jnp.zeros((head_pad, fc2_dims), dtype)
    wh = wh.at[:n_actions].set(wmu.astype(dtype))
    wh = wh.at[n_actions:head_n].set(wsig.astype(dtype))

    bh = jnp.zeros((head_pad, 1), dtype)
    bh = bh.at[:n_actions, 0].set(jnp.reshape(bmu, (-1,)).astype(dtype))
    bh = bh.at[n_actions:head_n, 0].set(jnp.reshape(bsig, (-1,)).astype(dtype))

    # Per-row clamp bounds: only the sigma rows are clamped to [1e-6, 1].
    lo = jnp.full((head_pad, 1), -jnp.inf, jnp.float32)
    lo = lo.at[n_actions:head_n].set(REPARAM_NOISE)
    hi = jnp.full((head_pad, 1), jnp.inf, jnp.float32)
    hi = hi.at[n_actions:head_n].set(1.0)

    return {
        "w1": w1.astype(dtype), "b1": jnp.reshape(b1, (-1, 1)).astype(dtype),
        "w2": w2.astype(dtype), "b2": jnp.reshape(b2, (-1, 1)).astype(dtype),
        "wh": wh, "bh": bh, "lo": lo, "hi": hi,
        "n_actions": n_actions, "head_pad": head_pad,
        "input_dim": input_dim, "fc1_dims": fc1_dims, "fc2_dims": fc2_dims,
    }


# ----------------------------------------------------------------------------
# Wrapper: transpose state so batch is the lane axis, pad, tile, slice outputs.
# ----------------------------------------------------------------------------
def actor_forward(state, prepped, *, block_b=2048):
    """TD3 actor forward. Returns (mu, sigma), each (batch, n_actions)."""
    n_actions = prepped["n_actions"]
    head_pad = prepped["head_pad"]
    input_dim = prepped["input_dim"]
    fc1_dims = prepped["fc1_dims"]
    fc2_dims = prepped["fc2_dims"]
    w1, b1 = prepped["w1"], prepped["b1"]
    w2, b2 = prepped["w2"], prepped["b2"]
    wh, bh = prepped["wh"], prepped["bh"]
    lo, hi = prepped["lo"], prepped["hi"]

    B = state.shape[0]
    # Batch tile: multiple of 128 lanes; capped by block_b (also lane-aligned).
    block_b = max(128, pl.cdiv(block_b, 128) * 128)
    tb = min(block_b, pl.cdiv(B, 128) * 128)
    B_pad = pl.cdiv(B, tb) * tb

    xT = jnp.transpose(state).astype(w1.dtype)          # (input_dim, B)
    if B_pad != B:
        xT = jnp.pad(xT, ((0, 0), (0, B_pad - B)))
    grid = (B_pad // tb,)

    resident = lambda i: (0, 0)                          # stays in VMEM

    out = pl.pallas_call(
        actor_forward_kernel,
        out_shape=jax.ShapeDtypeStruct((head_pad, B_pad), jnp.float32),
        grid_spec=pltpu.PrefetchScalarGridSpec(
            num_scalar_prefetch=0,
            grid=grid,
            in_specs=[
                pl.BlockSpec((input_dim, tb), lambda i: (0, i)),   # state (streamed)
                pl.BlockSpec((fc1_dims, input_dim), resident),     # w1
                pl.BlockSpec((fc1_dims, 1), resident),             # b1
                pl.BlockSpec((fc2_dims, fc1_dims), resident),      # w2
                pl.BlockSpec((fc2_dims, 1), resident),             # b2
                pl.BlockSpec((head_pad, fc2_dims), resident),      # fused head W
                pl.BlockSpec((head_pad, 1), resident),             # fused head b
                pl.BlockSpec((head_pad, 1), resident),             # clamp lo
                pl.BlockSpec((head_pad, 1), resident),             # clamp hi
            ],
            out_specs=pl.BlockSpec((head_pad, tb), lambda i: (0, i)),
        ),
        compiler_params=pltpu.CompilerParams(
            dimension_semantics=("parallel",)),          # v7x: shard steps over TCs
    )(xT, w1, b1, w2, b2, wh, bh, lo, hi)

    mu = jnp.transpose(out[:n_actions, :B])
    sigma = jnp.transpose(out[n_actions:2 * n_actions, :B])
    return mu, sigma


# ----------------------------------------------------------------------------
# Helpers for the self-test.
# ----------------------------------------------------------------------------
def init_linear(key, fan_in, fan_out):
    """PyTorch nn.Linear init: U(-1/sqrt(fan_in), 1/sqrt(fan_in)).
    Weight stored PyTorch-style as (fan_out, fan_in); bias as (fan_out,)."""
    kw, kb = jax.random.split(key)
    bound = 1.0 / jnp.sqrt(jnp.float32(fan_in))
    w = jax.random.uniform(kw, (fan_out, fan_in), jnp.float32, -bound, bound)
    b = jax.random.uniform(kb, (fan_out,), jnp.float32, -bound, bound)
    return w, b


def _reference(state, params):
    w1, b1, w2, b2, wmu, bmu, wsig, bsig = params
    h1 = jnp.maximum(state @ w1.T + b1, 0.0)
    h2 = jnp.maximum(h1 @ w2.T + b2, 0.0)
    mu = h2 @ wmu.T + bmu
    sigma = jnp.clip(h2 @ wsig.T + bsig, REPARAM_NOISE, 1.0)
    return mu, sigma


if __name__ == "__main__":
    # Small shapes consistent with the module: input_dims=(8,), fc1=fc2=32, n_actions=2.
    batch = 8
    input_dim = 8
    fc1_dims = 32
    fc2_dims = 32
    n_actions = 2

    key = jax.random.PRNGKey(0)
    k_state, k1, k2, k3, k4, k5 = jax.random.split(key, 6)

    state = jax.random.normal(k_state, (batch, input_dim), jnp.float32)

    w1, b1 = init_linear(k1, input_dim, fc1_dims)
    w2, b2 = init_linear(k2, fc1_dims, fc2_dims)
    wmu, bmu = init_linear(k3, fc2_dims, n_actions)
    wsig, bsig = init_linear(k4, fc2_dims, n_actions)
    params = (w1, b1, w2, b2, wmu, bmu, wsig, bsig)

    # One-time parameter prep (fused head, column biases, clamp bounds).
    prepped = prepare_actor_params(params)

    # --- small-batch path (single grid step) ---
    mu, sigma = actor_forward(state, prepped)
    jax.block_until_ready((mu, sigma))
    mu_ref, sigma_ref = _reference(state, params)
    assert mu.shape == (batch, n_actions) and sigma.shape == (batch, n_actions)
    assert jnp.allclose(mu, mu_ref, atol=1e-5), "mu mismatch"
    assert jnp.allclose(sigma, sigma_ref, atol=1e-5), "sigma mismatch"

    # --- batched / gridded path (non-multiple batch, multi-step grid) ---
    batch2 = 300
    state2 = jax.random.normal(k5, (batch2, input_dim), jnp.float32)
    mu2, sigma2 = actor_forward(state2, prepped, block_b=128)
    jax.block_until_ready((mu2, sigma2))
    mu2_ref, sigma2_ref = _reference(state2, params)
    assert mu2.shape == (batch2, n_actions) and sigma2.shape == (batch2, n_actions)
    assert jnp.allclose(mu2, mu2_ref, atol=1e-5), "mu mismatch (gridded)"
    assert jnp.allclose(sigma2, sigma2_ref, atol=1e-5), "sigma mismatch (gridded)"

    # TODO(synk): sample_normal (Normal.rsample / tanh squash / log_prob) stays in host
    # JAX; it could later be fused in-kernel via pltpu.prng_seed/prng_random_bits.
    print("KERNEL_OK")
</pallas_src>

<mosaic_0001>
module attributes {stable_mosaic.version = 11 : i64} {
  func.func @actor_forward_kernel(%arg0: i32, %arg1: memref<8x128xf32, #tpu.memory_space<vmem>>, %arg2: memref<32x8xf32, #tpu.memory_space<vmem>>, %arg3: memref<32x1xf32, #tpu.memory_space<vmem>>, %arg4: memref<32x32xf32, #tpu.memory_space<vmem>>, %arg5: memref<32x1xf32, #tpu.memory_space<vmem>>, %arg6: memref<8x32xf32, #tpu.memory_space<vmem>>, %arg7: memref<8x1xf32, #tpu.memory_space<vmem>>, %arg8: memref<8x1xf32, #tpu.memory_space<vmem>>, %arg9: memref<8x1xf32, #tpu.memory_space<vmem>>, %arg10: memref<8x128xf32, #tpu.memory_space<vmem>>) attributes {dimension_semantics = [#tpu.dimension_semantics<parallel>], iteration_bounds = array<i64: 1>, scalar_prefetch = 0 : i64, scratch_operands = 0 : i64, tpu.core_type = #tpu.core_type<tc>, window_params = [{transform_indices = @transform_0, window_bounds = array<i64: 8, 128>}, {pipeline_mode = #tpu.pipeline_mode<synchronous>, transform_indices = @transform_1, window_bounds = array<i64: 32, 8>}, {pipeline_mode = #tpu.pipeline_mode<synchronous>, transform_indices = @transform_2, window_bounds = array<i64: 32, 1>}, {pipeline_mode = #tpu.pipeline_mode<synchronous>, transform_indices = @transform_3, window_bounds = array<i64: 32, 32>}, {pipeline_mode = #tpu.pipeline_mode<synchronous>, transform_indices = @transform_4, window_bounds = array<i64: 32, 1>}, {pipeline_mode = #tpu.pipeline_mode<synchronous>, transform_indices = @transform_5, window_bounds = array<i64: 8, 32>}, {pipeline_mode = #tpu.pipeline_mode<synchronous>, transform_indices = @transform_6, window_bounds = array<i64: 8, 1>}, {pipeline_mode = #tpu.pipeline_mode<synchronous>, transform_indices = @transform_7, window_bounds = array<i64: 8, 1>}, {pipeline_mode = #tpu.pipeline_mode<synchronous>, transform_indices = @transform_8, window_bounds = array<i64: 8, 1>}, {transform_indices = @transform_9, window_bounds = array<i64: 8, 128>}]} {
    %c0 = arith.constant 0 : index
    %c0_0 = arith.constant 0 : index
    %0 = vector.load %arg1[%c0, %c0_0] : memref<8x128xf32, #tpu.memory_space<vmem>>, vector<8x128xf32>
    %c0_1 = arith.constant 0 : index
    %c0_2 = arith.constant 0 : index
    %1 = vector.load %arg2[%c0_1, %c0_2] : memref<32x8xf32, #tpu.memory_space<vmem>>, vector<32x8xf32>
    %cst = arith.constant dense<0.000000e+00> : vector<32x128xf32>
    %2 = tpu.matmul %1, %0, %cst {dimension_numbers = #tpu.dot_dimension_numbers<[1], [0], [0], [1], [0, 0, 1, 1], [], []>} : vector<32x8xf32>, vector<8x128xf32>, vector<32x128xf32> -> vector<32x128xf32>
    %c0_3 = arith.constant 0 : index
    %c0_4 = arith.constant 0 : index
    %3 = vector.load %arg3[%c0_3, %c0_4] : memref<32x1xf32, #tpu.memory_space<vmem>>, vector<32x1xf32>
    %4 = vector.broadcast %3 : vector<32x1xf32> to vector<32x128xf32>
    %5 = arith.addf %2, %4 : vector<32x128xf32>
    %cst_5 = arith.constant 0.000000e+00 : f32
    %6 = vector.broadcast %cst_5 : f32 to vector<32x128xf32>
    %7 = arith.maximumf %5, %6 : vector<32x128xf32>
    %c0_6 = arith.constant 0 : index
    %c0_7 = arith.constant 0 : index
    %8 = vector.load %arg4[%c0_6, %c0_7] : memref<32x32xf32, #tpu.memory_space<vmem>>, vector<32x32xf32>
    %cst_8 = arith.constant dense<0.000000e+00> : vector<32x128xf32>
    %9 = tpu.matmul %8, %7, %cst_8 {dimension_numbers = #tpu.dot_dimension_numbers<[1], [0], [0], [1], [0, 0, 1, 1], [], []>} : vector<32x32xf32>, vector<32x128xf32>, vector<32x128xf32> -> vector<32x128xf32>
    %c0_9 = arith.constant 0 : index
    %c0_10 = arith.constant 0 : index
    %10 = vector.load %arg5[%c0_9, %c0_10] : memref<32x1xf32, #tpu.memory_space<vmem>>, vector<32x1xf32>
    %11 = vector.broadcast %10 : vector<32x1xf32> to vector<32x128xf32>
    %12 = arith.addf %9, %11 : vector<32x128xf32>
    %cst_11 = arith.constant 0.000000e+00 : f32
    %13 = vector.broadcast %cst_11 : f32 to vector<32x128xf32>
    %14 = arith.maximumf %12, %13 : vector<32x128xf32>
    %c0_12 = arith.constant 0 : index
    %c0_13 = arith.constant 0 : index
    %15 = vector.load %arg6[%c0_12, %c0_13] : memref<8x32xf32, #tpu.memory_space<vmem>>, vector<8x32xf32>
    %cst_14 = arith.constant dense<0.000000e+00> : vector<8x128xf32>
    %16 = tpu.matmul %15, %14, %cst_14 {dimension_numbers = #tpu.dot_dimension_numbers<[1], [0], [0], [1], [0, 0, 1, 1], [], []>} : vector<8x32xf32>, vector<32x128xf32>, vector<8x128xf32> -> vector<8x128xf32>
    %c0_15 = arith.constant 0 : index
    %c0_16 = arith.constant 0 : index
    %17 = vector.load %arg7[%c0_15, %c0_16] : memref<8x1xf32, #tpu.memory_space<vmem>>, vector<8x1xf32>
    %18 = vector.broadcast %17 : vector<8x1xf32> to vector<8x128xf32>
    %19 = arith.addf %16, %18 : vector<8x128xf32>
    %c0_17 = arith.constant 0 : index
    %c0_18 = arith.constant 0 : index
    %20 = vector.load %arg8[%c0_17, %c0_18] : memref<8x1xf32, #tpu.memory_space<vmem>>, vector<8x1xf32>
    %21 = vector.broadcast %20 : vector<8x1xf32> to vector<8x128xf32>
    %22 = arith.maximumf %19, %21 : vector<8x128xf32>
    %c0_19 = arith.constant 0 : index
    %c0_20 = arith.constant 0 : index
    %23 = vector.load %arg9[%c0_19, %c0_20] : memref<8x1xf32, #tpu.memory_space<vmem>>, vector<8x1xf32>
    %24 = vector.broadcast %23 : vector<8x1xf32> to vector<8x128xf32>
    %25 = arith.minimumf %22, %24 : vector<8x128xf32>
    %c0_21 = arith.constant 0 : index
    %c0_22 = arith.constant 0 : index
    %26 = vector.load %arg10[%c0_21, %c0_22] : memref<8x128xf32, #tpu.memory_space<vmem>>, vector<8x128xf32>
    tpu.vector_store %arg10[%c0_21, %c0_22], %25 {strides = array<i32>} : memref<8x128xf32, #tpu.memory_space<vmem>>, vector<8x128xf32>,
    return
  }
  func.func @transform_0(%arg0: i32) -> (i32, i32) {
    %c0_i32 = arith.constant 0 : i32
    %c0_i32_0 = arith.constant 0 : i32
    return %c0_i32, %arg0 : i32, i32
  }
  func.func @transform_1(%arg0: i32) -> (i32, i32) {
    %c0_i32 = arith.constant 0 : i32
    %c0_i32_0 = arith.constant 0 : i32
    %c0_i32_1 = arith.constant 0 : i32
    return %c0_i32, %c0_i32_0 : i32, i32
  }
  func.func @transform_2(%arg0: i32) -> (i32, i32) {
    %c0_i32 = arith.constant 0 : i32
    %c0_i32_0 = arith.constant 0 : i32
    %c0_i32_1 = arith.constant 0 : i32
    return %c0_i32, %c0_i32_0 : i32, i32
  }
  func.func @transform_3(%arg0: i32) -> (i32, i32) {
    %c0_i32 = arith.constant 0 : i32
    %c0_i32_0 = arith.constant 0 : i32
    %c0_i32_1 = arith.constant 0 : i32
    return %c0_i32, %c0_i32_0 : i32, i32
  }
  func.func @transform_4(%arg0: i32) -> (i32, i32) {
    %c0_i32 = arith.constant 0 : i32
    %c0_i32_0 = arith.constant 0 : i32
    %c0_i32_1 = arith.constant 0 : i32
    return %c0_i32, %c0_i32_0 : i32, i32
  }
  func.func @transform_5(%arg0: i32) -> (i32, i32) {
    %c0_i32 = arith.constant 0 : i32
    %c0_i32_0 = arith.constant 0 : i32
    %c0_i32_1 = arith.constant 0 : i32
    return %c0_i32, %c0_i32_0 : i32, i32
  }
  func.func @transform_6(%arg0: i32) -> (i32, i32) {
    %c0_i32 = arith.constant 0 : i32
    %c0_i32_0 = arith.constant 0 : i32
    %c0_i32_1 = arith.constant 0 : i32
    return %c0_i32, %c0_i32_0 : i32, i32
  }
  func.func @transform_7(%arg0: i32) -> (i32, i32) {
    %c0_i32 = arith.constant 0 : i32
    %c0_i32_0 = arith.constant 0 : i32
    %c0_i32_1 = arith.constant 0 : i32
    return %c0_i32, %c0_i32_0 : i32, i32
  }
  func.func @transform_8(%arg0: i32) -> (i32, i32) {
    %c0_i32 = arith.constant 0 : i32
    %c0_i32_0 = arith.constant 0 : i32
    %c0_i32_1 = arith.constant 0 : i32
    return %c0_i32, %c0_i32_0 : i32, i32
  }
  func.func @transform_9(%arg0: i32) -> (i32, i32) {
    %c0_i32 = arith.constant 0 : i32
    %c0_i32_0 = arith.constant 0 : i32
    return %c0_i32, %arg0 : i32, i32
  }
}

</mosaic_0001>

<bundles_post_ra>
// kernel: tpu_custom_call.1
= control target key start
LH: loop header
LB: loop body
LE: loop exit
PB: predicated region body
PF: predicated region fallthrough
CT: control target
= control target key end

     0   :  { %vm62_vm0 = vcmask 64512   ;;  %v508_v5 = vmov 0   ;;  %s647_s0 = inlined_call_operand.vmem [shape: f32[8,128], index: 0, kind: input, shape index: {}]   ;;  %s648_s1 = inlined_call_operand.vmem [shape: f32[32,8], index: 1, kind: input, shape index: {}]   ;;  %s649_s2 = inlined_call_operand.vmem [shape: f32[32,1], index: 2, kind: input, shape index: {}]   ;;  %s650_s3 = inlined_call_operand.vmem [shape: f32[32,32], index: 3, kind: input, shape index: {}]   ;;  %s651_s4 = inlined_call_operand.vmem [shape: f32[32,1], index: 4, kind: input, shape index: {}]   ;;  %s652_s5 = inlined_call_operand.vmem [shape: f32[8,32], index: 5, kind: input, shape index: {}]   ;;  %s653_s6 = inlined_call_operand.vmem [shape: f32[8,1], index: 6, kind: input, shape index: {}]   ;;  %s654_s7 = inlined_call_operand.vmem [shape: f32[8,1], index: 7, kind: input, shape index: {}]   ;;  %s655_s8 = inlined_call_operand.vmem [shape: f32[8,1], index: 8, kind: input, shape index: {}]   ;;  %s656_s9 = inlined_call_operand.hbm [shape: f32[8,128], index: 9, kind: output, shape index: {}]  }
   0x1   :  { %v33_v0 = vld [vmem:[%s647_s0] sm:$0xff]  ;;  %v35_v2 = vld [vmem:[%s648_s1 + $0x8] sm:$0xff]  ;;  %v36_v3 = vld [vmem:[%s648_s1 + $0x10] sm:$0xff]  ;;  %482 = vset.pattern.permute.xlu0 %v508_v5  ;;  %483 = vset.pattern.permute.xlu1 %v508_v5 }
   0x2   :  { %v34_v1 = vld [vmem:[%s648_s1] sm:$0xff]  ;;  %430 = vmatprep.subr.mxu0 %v33_v0  ;;  %v40_v6 = vld [vmem:[%s649_s2 + $0x10] sm:$0xff]  ;;  %v37_v7 = vld [vmem:[%s648_s1 + $0x18] sm:$0xff] }
   0x3   :  { %432 = vmatprep.mubr.msk.f32.mxu0 %vm62_vm0, %v34_v1  ;;  %v38_v4 = vld [vmem:[%s649_s2] sm:$0xff]  ;;  %431 = vmatpush3.msra.mxu0 %v33_v0  ;;  %v39_v8 = vld [vmem:[%s649_s2 + $0x8] sm:$0xff] }
   0x4   :  { %433 = vmatmul.mubr.msk.f32.vlgmr.msra.gmra.mrb[0].mxu0 %vm62_vm0, %v35_v2  ;;  %44 = vperm.xlu0 %482, %v38_v4  }
   0x5   :  { %435 = vmatprep.mubr.msk.f32.mxu0 %vm62_vm0, %v36_v3  ;;  %54 = vperm.xlu1 %483, %v40_v6  }
   0x6   :  { %14 = vsyncpa [#allocation3], 0  ;;  %v41_v9 = vld [vmem:[%s649_s2 + $0x18] sm:$0xff]  ;;  %v168_v10 = vld [vmem:[%s651_s4] sm:$0xff]  ;;  %vm192_vm1 = vcmask 261120   ;;  %v509_v39 = vmov 0.0|0.0  }
   0x7   :  { %v169_v11 = vld [vmem:[%s651_s4 + $0x8] sm:$0xff]  ;;  %v170_v12 = vld [vmem:[%s651_s4 + $0x10] sm:$0xff]  ;;  %v171_v13 = vld [vmem:[%s651_s4 + $0x18] sm:$0xff]  ;;  %471 = vmatprep.subr.bf16.mxu0 %v509_v39  ;;  %vm510_vm2 = vmmov 0   ;;  %v511_v40 = vmov 0.0   ;;  %s512_s21 = smov [#allocation2]  }
   0x8   :  { %436 = vmatmul.mubr.msk.f32.gmra.mrb[2].mxu0 %vm62_vm0, %v37_v7  ;;  %49 = vperm.xlu0 %482, %v39_v8   ;;  %v295_v14 = vld [vmem:[%s653_s6] sm:$0xff]  ;;  %v165_v36 = vld [vmem:[%s650_s3 + $0x8] sm:$0xff]  ;;  %v166_v37 = vld [vmem:[%s650_s3 + $0x10] sm:$0xff]  ;;  %s395_s22 = sshll.u32 %s512_s21, 4  ;;  %s396_s22 = int_to_ptr.vmem [resolvable:$true] %s395_s22 }
   0x9   :  { %59 = vperm.xlu1 %483, %v41_v9   ;;  %v374_v15 = vld [vmem:[%s654_s7] sm:$0xff]  ;;  %v167_v38 = vld [vmem:[%s650_s3 + $0x18] sm:$0xff]  ;;  %460 = vmatprep.mubr.msk.f32.mxu0 %vm510_vm2, %v511_v40  ;;  %s484_s23 = scalar_lea.vmem %s396_s22, 128  ;;  %p489_p1 = scmp.lt.s32.totalorder %s396_s22, %s396_s22 }
   0xa   :  { %v381_v16 = vld [vmem:[%s655_s8] sm:$0xff]  ;;  %p485_p0 = scmp.ne.s32.totalorder %s396_s22, %s484_s23  ;;  %p490_p2 = scmp.lt.s32.totalorder %s484_s23, %s484_s23 }
   0xb   :  { %v164_v17 = vld [vmem:[%s650_s3] sm:$0xff] }
   0xc   :  { %174 = vperm.xlu0 %482, %v168_v10   ;;  %446 = vmatprep.mubr.msk.f32.mxu1 %vm192_vm1, %v164_v17  ;;  %v294_v59 = vld [vmem:[%s652_s5] sm:$0xff]  ;;  %p491_p3 = por %p490_p2, %p489_p1 }
   0xd   :  { %179 = vperm.xlu1 %483, %v169_v11  }
   0xe   :  { %p492_p4 = pnand %p491_p3, %p485_p0 }
  0x10   :  { %184 = vperm.xlu0 %482, %v170_v12  }
  0x11   :  { %189 = vperm.xlu1 %483, %v171_v13  }
  0x14   :  { %298 = vperm.xlu0 %482, %v295_v14  }
  0x15   :  { %377 = vperm.xlu1 %483, %v374_v15  }
  0x18   :  { %384 = vperm.xlu0 %482, %v381_v16  }
  0x83   :  { %v45_v18 = vpop.permute.xlu0 %44 }
  0x84   :  { %v55_v19 = vpop.permute.xlu1 %54 }
  0x87   :  { %v50_v20 = vpop.permute.xlu0 %49 }
  0x88   :  { %v60_v26 = vpop.permute.xlu1 %59 }
  0x8b   :  { %v175_v42 = vpop.permute.xlu0 %174 }
  0x8c   :  { %v180_v41 = vpop.permute.xlu1 %179 }
  0x8f   :  { %v185_v51 = vpop.permute.xlu0 %184 }
  0x90   :  { %v190_v48 = vpop.permute.xlu1 %189 }
  0x93   :  { %v299_v60 = vpop.permute.xlu0 %298 }
  0x94   :  { %v378_v0 = vpop.permute.xlu1 %377 }
  0x97   :  { %v385_v2 = vpop.permute.xlu0 %384 }
  0xd7   :  { %v434_v21 = vpop.f32.mrb[0].mxu0 }
  0xd8   :  { %v147_v22 = vadd.f32 %v434_v21, %v50_v20  ;;  %v141_v23 = vpop.f32.mrb[1].mxu0 }
  0xd9   :  { %v142_v24 = vadd.f32 %v141_v23, %v45_v18 }
  0xda   :  { %v161_v25 = vmax.f32 %v147_v22, 0.0 }
  0xdb   :  { %v160_v27 = vmax.f32 %v142_v24, 0.0  ;;  %v437_v28 = vpop.f32.mrb[2].mxu0 }
  0xdc   :  { %v157_v29 = vadd.f32 %v437_v28, %v60_v26  ;;  %v151_v30 = vpop.f32.mrb[3].mxu0 }
  0xdd   :  { %v152_v31 = vadd.f32 %v151_v30, %v55_v19  ;;  %v463_v32 = vpack.c.bf16 %v161_v25, %v160_v27 }
  0xde   :  { %v163_v33 = vmax.f32 %v157_v29, 0.0 }
  0xdf   :  { %v162_v34 = vmax.f32 %v152_v31, 0.0  ;;  %464 = vmatprep.subr.bf16.mxu1 %v463_v32 }
  0xe0   :  { %466 = vmatpush3.bf16.msra.mxu1 %v463_v32 }
  0xe1   :  { %v467_v35 = vpack.c.bf16 %v163_v33, %v162_v34 }
  0xe3   :  { %468 = vmatprep.subr.bf16.mxu1 %v467_v35 }
  0xe4   :  { %470 = vmatpush3.bf16.msra.mxu1 %v467_v35 }
  0xe7   :  { %447 = vmatmul.mubr.msk.f32.vlgmr.msra.gmra.mrb[0].mxu1 %vm192_vm1, %v165_v36 }
  0xe8   :  { %449 = vmatprep.mubr.msk.f32.mxu1 %vm192_vm1, %v166_v37 }
  0xeb   :  { %450 = vmatmul.mubr.msk.f32.gmra.mrb[2].mxu1 %vm192_vm1, %v167_v38 }
 0x1ba   :  { %v448_v43 = vpop.f32.mrb[0].mxu1 }
 0x1bb   :  { %v277_v44 = vadd.f32 %v448_v43, %v180_v41  ;;  %v271_v45 = vpop.f32.mrb[1].mxu1 }
 0x1bc   :  { %v272_v46 = vadd.f32 %v271_v45, %v175_v42 }
 0x1bd   :  { %v291_v47 = vmax.f32 %v277_v44, 0.0 }
 0x1be   :  { %v290_v49 = vmax.f32 %v272_v46, 0.0  ;;  %v451_v50 = vpop.f32.mrb[2].mxu1 }
 0x1bf   :  { %v287_v52 = vadd.f32 %v451_v50, %v190_v48  ;;  %v281_v53 = vpop.f32.mrb[3].mxu1 }
 0x1c0   :  { %v472_v54 = vpack.c.bf16 %v291_v47, %v290_v49  ;;  %v282_v55 = vadd.f32 %v281_v53, %v185_v51 }
 0x1c1   :  { %v293_v56 = vmax.f32 %v287_v52, 0.0 }
 0x1c2   :  { %v292_v57 = vmax.f32 %v282_v55, 0.0  ;;  %473 = vmatpush3.bf16.msra.mxu0 %v472_v54 }
 0x1c3   :  { %474 = vmatprep.subr.bf16.mxu0 %v509_v39 }
 0x1c4   :  { %v475_v58 = vpack.c.bf16 %v293_v56, %v292_v57 }
 0x1c6   :  { %476 = vmatpush3.bf16.msra.mxu0 %v475_v58 }
 0x1c9   :  { %461 = vmatmul.mubr.msk.f32.vlgmr.msra.gmra.mrb[4].mxu0 %vm192_vm1, %v294_v59 }
 0x29c   :  { %v370_v61 = vpop.f32.mrb[4].mxu0 }
 0x29d   :  { %v371_v62 = vadd.f32 %v370_v61, %v299_v60  ;;  %v462_v63 = vpop.f32.mrb[5].mxu0 }
 0x29f   :  { %v380_v1 = vmax.f32 %v371_v62, %v378_v0 }
 0x2a1   :  { %v387_v3 = vmin.f32 %v380_v1, %v385_v2 }
 0x2a3   :  { %388 = vst [vmem:[#allocation2] sm:$0xff] %v387_v3 }
 0x2a4   :  { %495 = shalt.err (!%p492_p4)
}
 0x2a5   :  { %s496_s25 = scalar_lea.hbm %s656_s9, 128 }
 0x2a6   :  { %p497_p5 = scmp.ne.s32.totalorder %s656_s9, %s496_s25  ;;  %p500_p6 = scmp.lt.u32.totalorder %s496_s25, %s656_s9 }
 0x2a8   :  { %p502_p7 = pnand %p500_p6, %p497_p5 }
 0x2aa   :  { %505 = shalt.err (!%p502_p7)
}
 0x2ab   :  { %398 = dma.vmem_to_hbm [thread:$0]  %s396_s22, 128, %s656_s9, [#allocation3]  }
 0x2ac   :  { %506 = dma.done.wait [#allocation3], 128  }
 0x2ad   :  { %507 = vsyncadd [#allocation3], 4294967168 }
 0x2ae   :  { %402 = vsyncpa [#allocation3], 1 }

</bundles_post_ra>
